<compile_context>
chip_gen: v5e
topology: v5e:2x2
jax: 0.10.0
libtpu: 0.0.40
codegen_flags: <defaults>
</compile_context>

<pallas_src>
import functools

import jax
import jax.numpy as jnp
from jax.experimental import pallas as pl
from jax.experimental.pallas import tpu as pltpu

BN_EPS = 1e-5
LEAKY_SLOPE = 0.01  # PyTorch nn.LeakyReLU() default


def _round_up(x, m):
    return ((x + m - 1) // m) * m


def _default_vmem_limit():
    """~48 MiB on v7x (64 MiB VMEM), ~96 MiB on v5e/v6e (128 MiB VMEM)."""
    try:
        cap = pltpu.get_tpu_info().vmem_capacity_bytes
    except Exception:
        cap = 64 * 1024 * 1024
    return min(int(cap * 3 // 4), 100 * 1024 * 1024)


_VMEM_LIMIT = _default_vmem_limit()
_MAX_TK = 2048  # K tile (lane-aligned) for large-channel stages


def _conv_stats_kernel(p_ref, w_ref, y_ref, stats_ref, acc_ref):
    """Per (M-tile, K-tile): conv-as-matmul (bf16 MXU, f32 acc).

    On the last K step: store the tile in bf16 and emit per-tile partial BN
    statistics (sum, sum-of-squares) computed from the f32 accumulator.

    p_ref:     (TM, TK) bf16  im2col patches tile
    w_ref:     (TK, Cp) bf16  flattened conv weight tile (channel zero-padded)
    y_ref:     (TM, Cp) bf16  pre-BN conv output tile
    stats_ref: (8, Cp)  f32   row 0: sum(y), row 1: sum(y*y); rows 2-7 unused
    acc_ref:   (TM, Cp) f32   VMEM accumulator scratch
    """
    @pl.when(pl.program_id(1) == 0)
    def _():
        acc_ref[...] = jnp.zeros_like(acc_ref)

    acc_ref[...] += jnp.dot(p_ref[...], w_ref[...],
                            preferred_element_type=jnp.float32)

    @pl.when(pl.program_id(1) == pl.num_programs(1) - 1)
    def _():
        y = acc_ref[...]                                    # f32, exact
        y_ref[...] = y.astype(y_ref.dtype)                  # bf16 to HBM
        stats_ref[0:1, :] = jnp.sum(y, axis=0, keepdims=True)
        stats_ref[1:2, :] = jnp.sum(y * y, axis=0, keepdims=True)
        # rows 2-7 intentionally left unwritten (never read back).


def _bn_lrelu_kernel(y_ref, scale_ref, shift_ref, o_ref):
    """Per M-tile: folded BatchNorm affine (one FMA) + LeakyReLU."""
    y = y_ref[...].astype(jnp.float32)
    y_hat = y * scale_ref[...] + shift_ref[...]
    o_ref[...] = jnp.where(y_hat >= 0, y_hat, LEAKY_SLOPE * y_hat).astype(
        o_ref.dtype)


@functools.partial(jax.jit, static_argnames=("block_m",))
def downsample_forward(x_nchw, weight, gamma, beta, *, block_m=512):
    """x_nchw: (N, C, H, W); weight: (C_out=C, C_in=C, 3, 3) PyTorch layout."""
    N, C, H, W = x_nchw.shape
    Hout = (H + 2 - 3) // 2 + 1
    Wout = (W + 2 - 3) // 2 + 1
    M = N * Hout * Wout
    K = 9 * C
    Cp = _round_up(C, 128)               # lane-dense channel dim (256 for 128<C<=256)
    tm = block_m                         # M tile for the MXU phase
    Mp = _round_up(M, tm)                # zero-pad rows: conv of a zero patch == 0
    num_m = Mp // tm

    # K tiling: single tile for small/mid C, 2048-wide tiles for large C so the
    # double-buffered bf16 patch/weight tiles stay inside the VMEM budget (v7x).
    if K <= _MAX_TK:
        tk, Kp = K, K
    else:
        tk = _MAX_TK
        Kp = _round_up(K, tk)
    num_k = Kp // tk

    # NCHW -> NHWC, bf16, reflect pad (padding_mode='reflect', pad=1).
    x = jnp.transpose(x_nchw, (0, 2, 3, 1)).astype(jnp.bfloat16)
    x_pad = jnp.pad(x, ((0, 0), (1, 1), (1, 1), (0, 0)), mode="reflect")

    # im2col patch extraction in bf16 (3x3 kernel, stride 2): (N,Hout,Wout,9,C).
    cols = jnp.stack(
        [x_pad[:, dy:dy + 2 * Hout:2, dx:dx + 2 * Wout:2, :]
         for dy in range(3) for dx in range(3)],
        axis=-2,
    )
    patches = cols.reshape(M, K)
    patches = jnp.pad(patches, ((0, Mp - M), (0, Kp - K)))

    # weight (C_out, C_in, 3, 3) -> (dy, dx, C_in, C_out) -> (Kp, Cp), bf16.
    w = jnp.transpose(weight.astype(jnp.float32), (2, 3, 1, 0)).reshape(K, C)
    w = jnp.pad(w, ((0, Kp - K), (0, Cp - C))).astype(jnp.bfloat16)

    # Keep the explicit zero pad on gamma: padded lanes then get scale == 0.
    gamma_p = jnp.pad(gamma.astype(jnp.float32), (0, Cp - C)).reshape(1, Cp)
    beta_p = jnp.pad(beta.astype(jnp.float32), (0, Cp - C)).reshape(1, Cp)

    # ---- Phase 1: conv (MXU, bf16 in / f32 acc) + partial BN statistics -----
    y_flat, part_stats = pl.pallas_call(
        _conv_stats_kernel,
        out_shape=(
            jax.ShapeDtypeStruct((Mp, Cp), jnp.bfloat16),
            jax.ShapeDtypeStruct((num_m * 8, Cp), jnp.float32),
        ),
        grid=(num_m, num_k),
        in_specs=[
            pl.BlockSpec((tm, tk), lambda i, k: (i, k)),
            pl.BlockSpec((tk, Cp), lambda i, k: (k, 0)),
        ],
        out_specs=(
            pl.BlockSpec((tm, Cp), lambda i, k: (i, 0)),
            pl.BlockSpec((8, Cp), lambda i, k: (i, 0)),
        ),
        scratch_shapes=[pltpu.VMEM((tm, Cp), jnp.float32)],
        compiler_params=pltpu.CompilerParams(
            dimension_semantics=("parallel", "arbitrary"),
            vmem_limit_bytes=_VMEM_LIMIT,
        ),
        cost_estimate=pl.CostEstimate(
            flops=2 * Mp * Kp * Cp,
            transcendentals=0,
            bytes_accessed=(Mp * Kp * 2 + num_m * Kp * Cp * 2 + Mp * Cp * 2
                            + num_m * 8 * Cp * 4),
        ),
    )(patches, w)

    # ---- Exact training-mode batch statistics (tiny per-channel math) -------
    part = part_stats.reshape(num_m, 8, Cp)
    s = jnp.sum(part[:, 0, :], axis=0, keepdims=True)     # (1, Cp)
    ss = jnp.sum(part[:, 1, :], axis=0, keepdims=True)    # (1, Cp)
    m_true = jnp.float32(M)                                # padded rows are zero
    mean = s / m_true
    var = jnp.maximum(ss / m_true - mean * mean, 0.0)      # biased, clamped >= 0
    inv_std = jax.lax.rsqrt(var + BN_EPS)
    scale = gamma_p * inv_std                              # fold BN -> one FMA
    shift = beta_p - mean * scale

    # ---- Phase 2: normalize + LeakyReLU (own, larger M tile) ----------------
    out_dtype = x_nchw.dtype
    budget_rows = max(tm, _VMEM_LIMIT // (16 * Cp))        # ~12 B/row/lane + slack
    tm2 = tm
    for mult in (8, 4, 2):
        cand = tm * mult
        if Mp % cand == 0 and cand <= budget_rows:
            tm2 = cand
            break
    num_m2 = Mp // tm2

    out_flat = pl.pallas_call(
        _bn_lrelu_kernel,
        out_shape=jax.ShapeDtypeStruct((Mp, Cp), out_dtype),
        grid=(num_m2,),
        in_specs=[
            pl.BlockSpec((tm2, Cp), lambda i: (i, 0)),
            pl.BlockSpec((1, Cp), lambda i: (0, 0)),
            pl.BlockSpec((1, Cp), lambda i: (0, 0)),
        ],
        out_specs=pl.BlockSpec((tm2, Cp), lambda i: (i, 0)),
        compiler_params=pltpu.CompilerParams(
            dimension_semantics=("parallel",),
            vmem_limit_bytes=_VMEM_LIMIT,
        ),
        cost_estimate=pl.CostEstimate(
            flops=3 * Mp * Cp,
            transcendentals=0,
            bytes_accessed=Mp * Cp * 2 + Mp * Cp * 4 + 2 * Cp * 4,
        ),
    )(y_flat, scale, shift)

    # (Mp, Cp) -> (N, Hout, Wout, C) -> NCHW
    out = out_flat[:M, :C].reshape(N, Hout, Wout, C)
    return jnp.transpose(out, (0, 3, 1, 2))


def _reference_forward(x_nchw, weight, gamma, beta, conv_dtype=jnp.float32):
    """Pure-JAX reference of the PyTorch DownSample (training-mode BN)."""
    x = x_nchw.astype(jnp.float32)
    x_pad = jnp.pad(x, ((0, 0), (0, 0), (1, 1), (1, 1)), mode="reflect")
    y = jax.lax.conv_general_dilated(
        x_pad.astype(conv_dtype),
        weight.astype(conv_dtype),
        window_strides=(2, 2),
        padding="VALID",
        dimension_numbers=("NCHW", "OIHW", "NCHW"),
        preferred_element_type=jnp.float32,
    )
    mean = jnp.mean(y, axis=(0, 2, 3), keepdims=True)
    var = jnp.mean((y - mean) ** 2, axis=(0, 2, 3), keepdims=True)
    y_hat = (y - mean) * jax.lax.rsqrt(var + BN_EPS)
    y_hat = y_hat * gamma.reshape(1, -1, 1, 1) + beta.reshape(1, -1, 1, 1)
    return jnp.where(y_hat >= 0, y_hat, LEAKY_SLOPE * y_hat)


if __name__ == "__main__":
    key = jax.random.PRNGKey(0)
    k_x, k_w, k_g, k_b = jax.random.split(key, 4)

    N, C, H, W = 2, 4, 16, 16
    x = jax.random.normal(k_x, (N, C, H, W), dtype=jnp.float32)
    # Conv2d(channel, channel, 3, stride=2, pad=1, reflect) weight, no bias.
    weight = jax.random.normal(k_w, (C, C, 3, 3), dtype=jnp.float32) * 0.1
    # BatchNorm2d affine params.
    gamma = 1.0 + 0.1 * jax.random.normal(k_g, (C,), dtype=jnp.float32)
    beta = 0.1 * jax.random.normal(k_b, (C,), dtype=jnp.float32)

    # Small block_m exercises the multi-tile grid + cross-tile BN-stats path;
    # the default (512) exercises the padded-M single-M-tile path.
    out_small = jax.block_until_ready(
        downsample_forward(x, weight, gamma, beta, block_m=32))
    out_big = jax.block_until_ready(
        downsample_forward(x, weight, gamma, beta, block_m=512))

    assert out_small.shape == (N, C, H // 2, W // 2), out_small.shape
    assert out_big.shape == (N, C, H // 2, W // 2), out_big.shape

    # Tight check vs. a reference that mirrors the kernel's deliberate bf16
    # operand/intermediate choice (f32 accumulation), loose check vs. full f32.
    ref_bf16 = _reference_forward(x, weight, gamma, beta, conv_dtype=jnp.bfloat16)
    ref_f32 = _reference_forward(x, weight, gamma, beta, conv_dtype=jnp.float32)

    for out in (out_small, out_big):
        assert jnp.allclose(out, ref_bf16, atol=1e-2, rtol=1e-2), float(
            jnp.max(jnp.abs(out - ref_bf16)))
        assert jnp.allclose(out, ref_f32, atol=5e-2, rtol=5e-2), float(
            jnp.max(jnp.abs(out - ref_f32)))

    print("KERNEL_OK")
</pallas_src>

<mosaic_0001>
module attributes {stable_mosaic.version = 11 : i64} {
  func.func @_conv_stats_kernel(%arg0: i32, %arg1: i32, %arg2: memref<32x36xbf16, #tpu.memory_space<vmem>>, %arg3: memref<36x128xbf16, #tpu.memory_space<vmem>>, %arg4: memref<32x128xbf16, #tpu.memory_space<vmem>>, %arg5: memref<8x128xf32, #tpu.memory_space<vmem>>, %arg6: memref<32x128xf32, #tpu.memory_space<vmem>>) attributes {dimension_semantics = [#tpu.dimension_semantics<parallel>, #tpu.dimension_semantics<arbitrary>], iteration_bounds = array<i64: 4, 1>, scalar_prefetch = 0 : i64, scratch_operands = 1 : i64, tpu.core_type = #tpu.core_type<tc>, window_params = [{transform_indices = @transform_0, window_bounds = array<i64: 32, 36>}, {transform_indices = @transform_1, window_bounds = array<i64: 36, 128>}, {transform_indices = @transform_2, window_bounds = array<i64: 32, 128>}, {transform_indices = @transform_3, window_bounds = array<i64: 8, 128>}]} {
    %c0_i32 = arith.constant 0 : i32
    %0 = arith.cmpi eq, %arg1, %c0_i32 : i32
    %1 = arith.extui %0 : i1 to i32
    %c0_i32_0 = arith.constant 0 : i32
    %2 = arith.cmpi ne, %1, %c0_i32_0 : i32
    scf.if %2 {
      %cst_10 = arith.constant 0.000000e+00 : f32
      %12 = vector.broadcast %cst_10 : f32 to vector<32x128xf32>
      %c0_11 = arith.constant 0 : index
      %c0_12 = arith.constant 0 : index
      %13 = vector.load %arg6[%c0_11, %c0_12] : memref<32x128xf32, #tpu.memory_space<vmem>>, vector<32x128xf32>
      tpu.vector_store %arg6[%c0_11, %c0_12], %12 {strides = array<i32>} : memref<32x128xf32, #tpu.memory_space<vmem>>, vector<32x128xf32>,
    } else {
    }
    %c0 = arith.constant 0 : index
    %c0_1 = arith.constant 0 : index
    %3 = vector.load %arg6[%c0, %c0_1] : memref<32x128xf32, #tpu.memory_space<vmem>>, vector<32x128xf32>
    %c0_2 = arith.constant 0 : index
    %c0_3 = arith.constant 0 : index
    %4 = vector.load %arg2[%c0_2, %c0_3] : memref<32x36xbf16, #tpu.memory_space<vmem>>, vector<32x36xbf16>
    %c0_4 = arith.constant 0 : index
    %c0_5 = arith.constant 0 : index
    %5 = vector.load %arg3[%c0_4, %c0_5] : memref<36x128xbf16, #tpu.memory_space<vmem>>, vector<36x128xbf16>
    %cst = arith.constant dense<0.000000e+00> : vector<32x128xf32>
    %6 = tpu.matmul %4, %5, %cst {dimension_numbers = #tpu.dot_dimension_numbers<[1], [0], [0], [1], [0, 0, 1, 1], [], []>} : vector<32x36xbf16>, vector<36x128xbf16>, vector<32x128xf32> -> vector<32x128xf32>
    %7 = arith.addf %3, %6 : vector<32x128xf32>
    %c0_6 = arith.constant 0 : index
    %c0_7 = arith.constant 0 : index
    %8 = vector.load %arg6[%c0_6, %c0_7] : memref<32x128xf32, #tpu.memory_space<vmem>>, vector<32x128xf32>
    tpu.vector_store %arg6[%c0_6, %c0_7], %7 {strides = array<i32>} : memref<32x128xf32, #tpu.memory_space<vmem>>, vector<32x128xf32>,
    %c0_i32_8 = arith.constant 0 : i32
    %9 = arith.cmpi eq, %arg1, %c0_i32_8 : i32
    %10 = arith.extui %9 : i1 to i32
    %c0_i32_9 = arith.constant 0 : i32
    %11 = arith.cmpi ne, %10, %c0_i32_9 : i32
    scf.if %11 {
      %c0_10 = arith.constant 0 : index
      %c0_11 = arith.constant 0 : index
      %12 = vector.load %arg6[%c0_10, %c0_11] : memref<32x128xf32, #tpu.memory_space<vmem>>, vector<32x128xf32>
      %13 = arith.truncf %12 : vector<32x128xf32> to vector<32x128xbf16>
      %c0_12 = arith.constant 0 : index
      %c0_13 = arith.constant 0 : index
      %14 = vector.load %arg4[%c0_12, %c0_13] : memref<32x128xbf16, #tpu.memory_space<vmem>>, vector<32x128xbf16>
      tpu.vector_store %arg4[%c0_12, %c0_13], %13 {strides = array<i32>} : memref<32x128xbf16, #tpu.memory_space<vmem>>, vector<32x128xbf16>,
      %cst_14 = arith.constant dense<0.000000e+00> : vector<128xf32>
      %15 = vector.multi_reduction <add>, %12, %cst_14 [0] : vector<32x128xf32> to vector<128xf32>
      %16 = vector.shape_cast %15 : vector<128xf32> to vector<1x128xf32>
      %c0_15 = arith.constant 0 : index
      %c0_16 = arith.constant 0 : index
      %17 = vector.load %arg5[%c0_15, %c0_16] : memref<8x128xf32, #tpu.memory_space<vmem>>, vector<1x128xf32>
      tpu.vector_store %arg5[%c0_15, %c0_16], %16 {strides = array<i32>} : memref<8x128xf32, #tpu.memory_space<vmem>>, vector<1x128xf32>,
      %18 = arith.mulf %12, %12 : vector<32x128xf32>
      %cst_17 = arith.constant dense<0.000000e+00> : vector<128xf32>
      %19 = vector.multi_reduction <add>, %18, %cst_17 [0] : vector<32x128xf32> to vector<128xf32>
      %20 = vector.shape_cast %19 : vector<128xf32> to vector<1x128xf32>
      %c1 = arith.constant 1 : index
      %c0_18 = arith.constant 0 : index
      %21 = vector.load %arg5[%c1, %c0_18] : memref<8x128xf32, #tpu.memory_space<vmem>>, vector<1x128xf32>
      tpu.vector_store %arg5[%c1, %c0_18], %20 {strides = array<i32>} : memref<8x128xf32, #tpu.memory_space<vmem>>, vector<1x128xf32>,
    } else {
    }
    return
  }
  func.func @transform_0(%arg0: i32, %arg1: i32) -> (i32, i32) {
    %c0_i32 = arith.constant 0 : i32
    return %arg0, %arg1 : i32, i32
  }
  func.func @transform_1(%arg0: i32, %arg1: i32) -> (i32, i32) {
    %c0_i32 = arith.constant 0 : i32
    %c0_i32_0 = arith.constant 0 : i32
    return %arg1, %c0_i32 : i32, i32
  }
  func.func @transform_2(%arg0: i32, %arg1: i32) -> (i32, i32) {
    %c0_i32 = arith.constant 0 : i32
    %c0_i32_0 = arith.constant 0 : i32
    return %arg0, %c0_i32 : i32, i32
  }
  func.func @transform_3(%arg0: i32, %arg1: i32) -> (i32, i32) {
    %c0_i32 = arith.constant 0 : i32
    %c0_i32_0 = arith.constant 0 : i32
    return %arg0, %c0_i32 : i32, i32
  }
}

module attributes {stable_mosaic.version = 11 : i64} {
  func.func @_bn_lrelu_kernel(%arg0: i32, %arg1: memref<128x128xbf16, #tpu.memory_space<vmem>>, %arg2: memref<1x128xf32, #tpu.memory_space<vmem>>, %arg3: memref<1x128xf32, #tpu.memory_space<vmem>>, %arg4: memref<128x128xf32, #tpu.memory_space<vmem>>) attributes {dimension_semantics = [#tpu.dimension_semantics<parallel>], iteration_bounds = array<i64: 1>, scalar_prefetch = 0 : i64, scratch_operands = 0 : i64, tpu.core_type = #tpu.core_type<tc>, window_params = [{transform_indices = @transform_0, window_bounds = array<i64: 128, 128>}, {pipeline_mode = #tpu.pipeline_mode<synchronous>, transform_indices = @transform_1, window_bounds = array<i64: 1, 128>}, {pipeline_mode = #tpu.pipeline_mode<synchronous>, transform_indices = @transform_2, window_bounds = array<i64: 1, 128>}, {transform_indices = @transform_3, window_bounds = array<i64: 128, 128>}]} {
    %c0 = arith.constant 0 : index
    %c0_0 = arith.constant 0 : index
    %0 = vector.load %arg1[%c0, %c0_0] : memref<128x128xbf16, #tpu.memory_space<vmem>>, vector<128x128xbf16>
    %1 = arith.extf %0 : vector<128x128xbf16> to vector<128x128xf32>
    %c0_1 = arith.constant 0 : index
    %c0_2 = arith.constant 0 : index
    %2 = vector.load %arg2[%c0_1, %c0_2] : memref<1x128xf32, #tpu.memory_space<vmem>>, vector<1x128xf32>
    %3 = vector.broadcast %2 : vector<1x128xf32> to vector<128x128xf32>
    %4 = arith.mulf %1, %3 : vector<128x128xf32>
    %c0_3 = arith.constant 0 : index
    %c0_4 = arith.constant 0 : index
    %5 = vector.load %arg3[%c0_3, %c0_4] : memref<1x128xf32, #tpu.memory_space<vmem>>, vector<1x128xf32>
    %6 = vector.broadcast %5 : vector<1x128xf32> to vector<128x128xf32>
    %7 = arith.addf %4, %6 : vector<128x128xf32>
    %cst = arith.constant 0.000000e+00 : f32
    %8 = vector.broadcast %cst : f32 to vector<128x128xf32>
    %9 = arith.cmpf oge, %7, %8 : vector<128x128xf32>
    %cst_5 = arith.constant 0.00999999977 : f32
    %10 = vector.broadcast %cst_5 : f32 to vector<128x128xf32>
    %11 = arith.mulf %10, %7 : vector<128x128xf32>
    %12 = arith.select %9, %7, %11 : vector<128x128xi1>, vector<128x128xf32>
    %c0_6 = arith.constant 0 : index
    %c0_7 = arith.constant 0 : index
    %13 = vector.load %arg4[%c0_6, %c0_7] : memref<128x128xf32, #tpu.memory_space<vmem>>, vector<128x128xf32>
    tpu.vector_store %arg4[%c0_6, %c0_7], %12 {strides = array<i32>} : memref<128x128xf32, #tpu.memory_space<vmem>>, vector<128x128xf32>,
    return
  }
  func.func @transform_0(%arg0: i32) -> (i32, i32) {
    %c0_i32 = arith.constant 0 : i32
    %c0_i32_0 = arith.constant 0 : i32
    return %arg0, %c0_i32 : i32, i32
  }
  func.func @transform_1(%arg0: i32) -> (i32, i32) {
    %c0_i32 = arith.constant 0 : i32
    %c0_i32_0 = arith.constant 0 : i32
    %c0_i32_1 = arith.constant 0 : i32
    return %c0_i32, %c0_i32_0 : i32, i32
  }
  func.func @transform_2(%arg0: i32) -> (i32, i32) {
    %c0_i32 = arith.constant 0 : i32
    %c0_i32_0 = arith.constant 0 : i32
    %c0_i32_1 = arith.constant 0 : i32
    return %c0_i32, %c0_i32_0 : i32, i32
  }
  func.func @transform_3(%arg0: i32) -> (i32, i32) {
    %c0_i32 = arith.constant 0 : i32
    %c0_i32_0 = arith.constant 0 : i32
    return %arg0, %c0_i32 : i32, i32
  }
}

</mosaic_0001>

<bundles_post_ra>
// kernel: downsample_forward.2
= control target key start
LH: loop header
LB: loop body
LE: loop exit
PB: predicated region body
PF: predicated region fallthrough
CT: control target
= control target key end

     0   :  { %s585_s12 = smov 0   ;;  %s587_s13 = smov 0   ;;  %s635_s0 = inlined_call_operand.vmem [shape: bf16[128,36], index: 0, kind: input, shape index: {}]   ;;  %s636_s1 = inlined_call_operand.vmem [shape: bf16[36,128], index: 1, kind: input, shape index: {}]   ;;  %s637_s2 = inlined_call_operand.vmem [shape: bf16[128,128], index: 2, kind: output, shape index: {0}]   ;;  %s638_s3 = inlined_call_operand.vmem [shape: f32[32,128], index: 3, kind: output, shape index: {1}]  }
   0x1   :  { %s589_s14 = smov 0  }
   0x2 LB: > { %s26_s15 = sadd.s32 1, %s559_s13  ;;  %p473_p0 = scmp.ge.s32.totalorder %s563_s14, 1  ;;  %s563_s14 = sphi %s589_s14, %s14_s14   ;;  %s559_s13 = sphi %s587_s13, %s640_s13   ;;  %s555_s12 = sphi %s585_s12, %s639_s12  }
   0x3   : > { %p28_p1 = scmp.ge.s32.totalorder %s26_s15, 4  ;;  %p169_p2 = scmp.lt.s32.totalorder %s563_s14, 5 }
   0x5   : > { %s642_s15 = smov (%p28_p1, %s26_s15), 0  ;;  %p170_p3 = pnand %p473_p0, %p169_p2 }
   0x6   : > { %s474_s18 = sshll.u32 (!%p170_p3), %s555_s12, 2  ;;  %p226_p5 = scmp.lt.s32.totalorder (!%p170_p3), %s555_s12, 3 }
   0x7   : > { %173 = sbr.rel (%p170_p3) target bundleno = 184 (0xb8), region = 28  ;;  %p206_p4 = scmp.lt.s32.totalorder (!%p170_p3), %s474_s18, 15 }
   0xc   : > { %v251_v0 = vld [vmem:[%s636_s1 + $0x10] sm:$0x3]  ;;  %vm284_vm0 = vcmask 1041408   ;;  %s644_s18 = smov (!%p206_p4, %s474_s18), 15  ;;  %v502_v4 = vld [vmem:[%s636_s1 + $0x8] sm:$0xff]  ;;  %v501_v5 = vld [vmem:[%s636_s1] sm:$0xff] }
   0xd   : > { %v271_v1 = vunpack.c.l.b16 %v251_v0  ;;  %s475_s21 = sshll.u32 %s644_s18, 2  ;;  %vm277_vm1 = vcmask 293888   ;;  %s646_s12 = smov (!%p226_p5, %s555_s12), 3 }
   0xe   : > { %s212_s26 = scalar_lea.vmem %s635_s0, %s475_s21  ;;  %s224_s29 = scalar_lea.vmem %s637_s2, %s475_s21 }
   0xf   : > { %v274_v2 = vpack.c.b16 %v271_v1, %v271_v1  ;;  %v499_v6 = vld [vmem:[%s212_s26] sm:$0xff]  ;;  %v500_v7 = vld [vmem:[%s212_s26 + $0x8] sm:$0xff]  ;;  %s478_s30 = sshll.u32 %s646_s12, 3 }
  0x10   : > { %s229_s6 = scalar_lea.vmem %s638_s3, %s478_s30 }
  0x11   : > { %v286_v3 = vsel %vm284_vm0, %v274_v2, 0 }
  0x12   : > { %293 = vmatpush.bf16.msra.mxu0 %v286_v3  ;;  %514 = vmatpush.bf16.msra.mxu1 %v286_v3 }
  0x16   : > { %294 = vmatpush.bf16.msra.mxu0 %v502_v4  ;;  %515 = vmatpush.bf16.msra.mxu1 %v502_v4 }
  0x1a   : > { %295 = vmatpush.bf16.msra.mxu0 %v501_v5  ;;  %516 = vmatpush.bf16.msra.mxu1 %v501_v5 }
  0x1d   : > { %495 = vmatmul.msk.bf16.vlgmr.msra.gmra.mxu0 %vm277_vm1, %v499_v6  ;;  %496 = vmatmul.msk.bf16.vlgmr.msra.gmra.mxu1 %vm277_vm1, %v500_v7 }
  0x9a   : > { %v297_v8 = vpop.f32.mrf.mxu0  ;;  %v302_v9 = vpop.f32.mrf.mxu1 }
  0x9b   : > { %v340_v10 = vmul.f32 %v297_v8, %v297_v8  ;;  %v342_v17 = vmul.f32 %v302_v9, %v302_v9 }
  0xa2   : > { %v299_v11 = vpop.f32.mrf.mxu0  ;;  %v304_v12 = vpop.f32.mrf.mxu1 }
  0xa3   : > { %v506_v13 = vpack.c.bf16 %v299_v11, %v297_v8  ;;  %v330_v14 = vadd.f32 %v299_v11, %v297_v8  ;;  %v341_v15 = vmul.f32 %v299_v11, %v299_v11  ;;  %v511_v16 = vpack.c.bf16 %v304_v12, %v302_v9 }
  0xa4   : > { %v343_v21 = vmul.f32 %v304_v12, %v304_v12 }
  0xa5   : > { %507 = vst [vmem:[%s224_s29] sm:$0xff] %v506_v13   ;;  %v344_v18 = vadd.f32 %v341_v15, %v340_v10  ;;  %v331_v19 = vadd.f32 %v330_v14, %v302_v9 }
  0xa6   : > { %513 = vst [vmem:[%s224_s29 + $0x8] sm:$0xff] %v511_v16  }
  0xa7   : > { %v332_v20 = vadd.f32 %v331_v19, %v304_v12  ;;  %v345_v22 = vadd.f32 %v344_v18, %v342_v17 }
  0xa9   : > { %v333_v23 = vrot.slane %v332_v20, 4  ;;  %v346_v24 = vadd.f32 %v345_v22, %v343_v21 }
  0xab   : > { %v334_v25 = vadd.f32 %v333_v23, %v332_v20  ;;  %v347_v26 = vrot.slane %v346_v24, 4 }
  0xad   : > { %v335_v27 = vrot.slane %v334_v25, 2  ;;  %v348_v28 = vadd.f32 %v347_v26, %v346_v24 }
  0xaf   : > { %v336_v29 = vadd.f32 %v335_v27, %v334_v25  ;;  %v349_v30 = vrot.slane %v348_v28, 2 }
  0xb1   : > { %v337_v31 = vrot.slane %v336_v29, 1  ;;  %v350_v32 = vadd.f32 %v349_v30, %v348_v28 }
  0xb3   : > { %v338_v33 = vadd.f32 %v337_v31, %v336_v29  ;;  %v351_v34 = vrot.slane %v350_v32, 1 }
  0xb5   : > { %339 = vst [vmem:[%s229_s6] sm:$0x1] %v338_v33  ;;  %v352_v35 = vadd.f32 %v351_v34, %v350_v32 }
  0xb7   : > { %353 = vst [vmem:[%s229_s6 + $0x1] sm:$0x1] %v352_v35 }
  0xb8 PF: > { %s14_s14 = sadd.s32 1, %s563_s14   ;;  %s639_s12 = smov %s559_s13 }
  0xb9   : > { %p11_p6 = scmp.ge.s32.totalorder %s14_s14, 6   ;;  %s640_s13 = smov %s642_s15 }
  0xbb   :  { %13 = sbr.rel (!%p11_p6) target bundleno = 2 (0x2), region = 81 }

// kernel: downsample_forward.3
= control target key start
LH: loop header
LB: loop body
LE: loop exit
PB: predicated region body
PF: predicated region fallthrough
CT: control target
= control target key end

     0   :  { %s329_s0 = inlined_call_operand.vmem [shape: bf16[128,128], index: 0, kind: input, shape index: {}]   ;;  %s330_s1 = inlined_call_operand.vmem [shape: f32[1,128], index: 1, kind: input, shape index: {}]   ;;  %s331_s2 = inlined_call_operand.vmem [shape: f32[1,128], index: 2, kind: input, shape index: {}]   ;;  %s332_s3 = inlined_call_operand.vmem [shape: f32[128,128], index: 3, kind: output, shape index: {}]  }
   0x1   :  { %v155_v0 = vld [vmem:[%s329_s0] sm:$0xff]   ;;  %v186_v5 = vld [vmem:[%s329_s0 + $0x8] sm:$0xff]   ;;  %v187_v8 = vld [vmem:[%s329_s0 + $0x10] sm:$0xff]  }
   0x2   :  { %v221_v1 = vld [vmem:[%s330_s1] ss:$0 sm:$0xff]  ;;  %v156_v2 = vunpack.c.l.bf16 %v155_v0  ;;  %v157_v4 = vunpack.c.h.bf16 %v155_v0  ;;  %v160_v6 = vunpack.c.l.bf16 %v186_v5  ;;  %v161_v7 = vunpack.c.h.bf16 %v186_v5  ;;  %v188_v9 = vld [vmem:[%s329_s0 + $0x18] sm:$0xff]   ;;  %v190_v39 = vld [vmem:[%s329_s0 + $0x28] sm:$0xff]  }
   0x3   :  { %v226_v3 = vld [vmem:[%s331_s2] ss:$0 sm:$0xff]  ;;  %v164_v12 = vunpack.c.l.bf16 %v187_v8  ;;  %v165_v13 = vunpack.c.h.bf16 %v187_v8  ;;  %v168_v16 = vunpack.c.l.bf16 %v188_v9  ;;  %v169_v17 = vunpack.c.h.bf16 %v188_v9  ;;  %v191_v42 = vld [vmem:[%s329_s0 + $0x30] sm:$0xff]   ;;  %v192_v49 = vld [vmem:[%s329_s0 + $0x38] sm:$0xff]  }
   0x4   :  { %v50_v10 = vmul.f32 %v221_v1, %v156_v2  ;;  %v51_v11 = vmul.f32 %v221_v1, %v157_v4  ;;  %v52_v14 = vmul.f32 %v221_v1, %v160_v6  ;;  %v53_v15 = vmul.f32 %v221_v1, %v161_v7  ;;  %v189_v26 = vld [vmem:[%s329_s0 + $0x20] sm:$0xff]  }
   0x5   :  { %v54_v20 = vmul.f32 %v221_v1, %v164_v12  ;;  %v55_v21 = vmul.f32 %v221_v1, %v165_v13  ;;  %v56_v24 = vmul.f32 %v221_v1, %v168_v16  ;;  %v57_v25 = vmul.f32 %v221_v1, %v169_v17 }
   0x6   :  { %v70_v18 = vadd.f32 %v226_v3, %v50_v10  ;;  %v71_v19 = vadd.f32 %v226_v3, %v51_v11  ;;  %v72_v22 = vadd.f32 %v226_v3, %v52_v14  ;;  %v73_v23 = vadd.f32 %v226_v3, %v53_v15 }
   0x7   :  { %v74_v33 = vadd.f32 %v226_v3, %v54_v20  ;;  %v75_v34 = vadd.f32 %v226_v3, %v55_v21  ;;  %v76_v37 = vadd.f32 %v226_v3, %v56_v24  ;;  %v77_v38 = vadd.f32 %v226_v3, %v57_v25 }
   0x8   :  { %vm86_vm0 = vcmp.ge.f32.partialorder %v70_v18, 0.0  ;;  %v102_v27 = vmul.f32 0.01, %v70_v18  ;;  %vm87_vm1 = vcmp.ge.f32.partialorder %v71_v19, 0.0  ;;  %v103_v28 = vmul.f32 0.01, %v71_v19 }
   0x9   :  { %vm88_vm2 = vcmp.ge.f32.partialorder %v72_v22, 0.0  ;;  %v104_v29 = vmul.f32 0.01, %v72_v22  ;;  %vm89_vm3 = vcmp.ge.f32.partialorder %v73_v23, 0.0  ;;  %v105_v30 = vmul.f32 0.01, %v73_v23 }
   0xa   :  { %v118_v31 = vsel %vm86_vm0, %v70_v18, %v102_v27  ;;  %v119_v32 = vsel %vm87_vm1, %v71_v19, %v103_v28  ;;  %vm90_vm4 = vcmp.ge.f32.partialorder %v74_v33, 0.0  ;;  %v106_v40 = vmul.f32 0.01, %v74_v33 }
   0xb   :  { %134 = vst [vmem:[%s332_s3] sm:$0xff] %v118_v31  ;;  %v120_v35 = vsel %vm88_vm2, %v72_v22, %v104_v29  ;;  %v121_v36 = vsel %vm89_vm3, %v73_v23, %v105_v30  ;;  %vm91_vm5 = vcmp.ge.f32.partialorder %v75_v34, 0.0  ;;  %v172_v41 = vunpack.c.l.bf16 %v189_v26 }
   0xc   :  { %135 = vst [vmem:[%s332_s3 + $0x8] sm:$0xff] %v119_v32  ;;  %v107_v43 = vmul.f32 0.01, %v75_v34  ;;  %vm92_vm6 = vcmp.ge.f32.partialorder %v76_v37, 0.0  ;;  %v108_v44 = vmul.f32 0.01, %v76_v37  ;;  %v173_v45 = vunpack.c.h.bf16 %v189_v26 }
   0xd   :  { %136 = vst [vmem:[%s332_s3 + $0x10] sm:$0xff] %v120_v35  ;;  %v122_v46 = vsel %vm90_vm4, %v74_v33, %v106_v40  ;;  %vm93_vm7 = vcmp.ge.f32.partialorder %v77_v38, 0.0  ;;  %v109_v47 = vmul.f32 0.01, %v77_v38  ;;  %v58_v48 = vmul.f32 %v221_v1, %v172_v41 }
   0xe   :  { %137 = vst [vmem:[%s332_s3 + $0x18] sm:$0xff] %v121_v36  ;;  %v123_v50 = vsel %vm91_vm5, %v75_v34, %v107_v43  ;;  %v124_v51 = vsel %vm92_vm6, %v76_v37, %v108_v44  ;;  %v59_v52 = vmul.f32 %v221_v1, %v173_v45  ;;  %v176_v53 = vunpack.c.l.bf16 %v190_v39 }
   0xf   :  { %138 = vst [vmem:[%s332_s3 + $0x20] sm:$0xff] %v122_v46  ;;  %v125_v54 = vsel %vm93_vm7, %v77_v38, %v109_v47  ;;  %v78_v55 = vadd.f32 %v226_v3, %v58_v48  ;;  %v177_v56 = vunpack.c.h.bf16 %v190_v39  ;;  %v180_v57 = vunpack.c.l.bf16 %v191_v42 }
  0x10   :  { %139 = vst [vmem:[%s332_s3 + $0x28] sm:$0xff] %v123_v50  ;;  %v79_v58 = vadd.f32 %v226_v3, %v59_v52  ;;  %v60_v59 = vmul.f32 %v221_v1, %v176_v53  ;;  %v181_v60 = vunpack.c.h.bf16 %v191_v42  ;;  %v184_v61 = vunpack.c.l.bf16 %v192_v49 }
  0x11   :  { %140 = vst [vmem:[%s332_s3 + $0x30] sm:$0xff] %v124_v51  ;;  %vm94_vm8 = vcmp.ge.f32.partialorder %v78_v55, 0.0  ;;  %v110_v62 = vmul.f32 0.01, %v78_v55  ;;  %v61_v63 = vmul.f32 %v221_v1, %v177_v56  ;;  %v62_v0 = vmul.f32 %v221_v1, %v180_v57 }
  0x12   :  { %141 = vst [vmem:[%s332_s3 + $0x38] sm:$0xff] %v125_v54  ;;  %vm95_vm9 = vcmp.ge.f32.partialorder %v79_v58, 0.0  ;;  %v111_v2 = vmul.f32 0.01, %v79_v58  ;;  %v80_v4 = vadd.f32 %v226_v3, %v60_v59  ;;  %v63_v5 = vmul.f32 %v221_v1, %v181_v60 }
  0x13   :  { %v126_v6 = vsel %vm94_vm8, %v78_v55, %v110_v62  ;;  %v81_v7 = vadd.f32 %v226_v3, %v61_v63  ;;  %v82_v8 = vadd.f32 %v226_v3, %v62_v0  ;;  %v64_v9 = vmul.f32 %v221_v1, %v184_v61 }
  0x14   :  { %142 = vst [vmem:[%s332_s3 + $0x40] sm:$0xff] %v126_v6  ;;  %v127_v10 = vsel %vm95_vm9, %v79_v58, %v111_v2  ;;  %vm96_vm10 = vcmp.ge.f32.partialorder %v80_v4, 0.0  ;;  %v112_v11 = vmul.f32 0.01, %v80_v4  ;;  %v83_v12 = vadd.f32 %v226_v3, %v63_v5 }
  0x15   :  { %143 = vst [vmem:[%s332_s3 + $0x48] sm:$0xff] %v127_v10  ;;  %vm97_vm11 = vcmp.ge.f32.partialorder %v81_v7, 0.0  ;;  %v113_v13 = vmul.f32 0.01, %v81_v7  ;;  %vm98_vm12 = vcmp.ge.f32.partialorder %v82_v8, 0.0  ;;  %v84_v14 = vadd.f32 %v226_v3, %v64_v9 }
  0x16   :  { %v128_v15 = vsel %vm96_vm10, %v80_v4, %v112_v11  ;;  %v114_v16 = vmul.f32 0.01, %v82_v8  ;;  %vm99_vm13 = vcmp.ge.f32.partialorder %v83_v12, 0.0  ;;  %v115_v17 = vmul.f32 0.01, %v83_v12 }
  0x17   :  { %144 = vst [vmem:[%s332_s3 + $0x50] sm:$0xff] %v128_v15  ;;  %v129_v18 = vsel %vm97_vm11, %v81_v7, %v113_v13  ;;  %vm100_vm14 = vcmp.ge.f32.partialorder %v84_v14, 0.0  ;;  %v116_v19 = vmul.f32 0.01, %v84_v14  ;;  %v185_v20 = vunpack.c.h.bf16 %v192_v49 }
  0x18   :  { %145 = vst [vmem:[%s332_s3 + $0x58] sm:$0xff] %v129_v18  ;;  %v130_v21 = vsel %vm98_vm12, %v82_v8, %v114_v16  ;;  %v131_v22 = vsel %vm99_vm13, %v83_v12, %v115_v17 }
  0x19   :  { %146 = vst [vmem:[%s332_s3 + $0x60] sm:$0xff] %v130_v21  ;;  %v132_v23 = vsel %vm100_vm14, %v84_v14, %v116_v19  ;;  %v65_v24 = vmul.f32 %v221_v1, %v185_v20 }
  0x1a   :  { %147 = vst [vmem:[%s332_s3 + $0x68] sm:$0xff] %v131_v22 }
  0x1b   :  { %148 = vst [vmem:[%s332_s3 + $0x70] sm:$0xff] %v132_v23  ;;  %v85_v25 = vadd.f32 %v226_v3, %v65_v24 }
  0x1d   :  { %vm101_vm15 = vcmp.ge.f32.partialorder %v85_v25, 0.0  ;;  %v117_v26 = vmul.f32 0.01, %v85_v25 }
  0x1f   :  { %v133_v27 = vsel %vm101_vm15, %v85_v25, %v117_v26 }
  0x20   :  { %149 = vst [vmem:[%s332_s3 + $0x78] sm:$0xff] %v133_v27 }

</bundles_post_ra>
